<compile_context>
chip_gen: v7x
topology: tpu7x:2x2x1
jax: 0.10.0
libtpu: 0.0.40
codegen_flags: <defaults>
</compile_context>

<pallas_src>
import functools

import jax
import jax.numpy as jnp
from jax.experimental import pallas as pl
from jax.experimental.pallas import tpu as pltpu

IGNORE_INDEX = 250
_LANE = 128
_SUBLANE = 8
_TILE_BYTES_TARGET = 2 * 1024 * 1024   # ~2 MiB of logits per grid step
_TILE_P_MAX = 64 * 1024                # cap on pixels per tile


def _ce_kernel(logits_ref, target_ref, loss_ref, count_ref, *, hw):
    """One grid step: per-tile partial (loss_sum, valid_count).

    logits_ref : (1, C, TILE_P)   model dtype (cast to f32 in-kernel)
    target_ref : (1, 1, TILE_P)   int32
    loss_ref   : (1, 1, 8, 128)   f32   partial sum at [..., 0, 0]
    count_ref  : (1, 1, 8, 128)   int32 partial count at [..., 0, 0]
    """
    p = pl.program_id(1)

    x = logits_ref[0].astype(jnp.float32)            # (C, TILE_P)
    t = target_ref[0]                                # (1, TILE_P) int32
    _, tile_p = x.shape

    # Positional mask: the last pixel tile may over-read past HW (Pallas pads
    # it with unspecified data) -- mask those lanes out.
    pix = jax.lax.broadcasted_iota(jnp.int32, (1, tile_p), 1) + p * tile_p
    in_bounds = pix < hw

    # Numerically stable log-softmax over the class (sublane) axis.
    m = jnp.max(x, axis=0, keepdims=True)                              # (1, TILE_P)
    lse = jnp.log(jnp.sum(jnp.exp(x - m), axis=0, keepdims=True)) + m  # (1, TILE_P)

    # Gather the logit at the target class via one-hot compare (no dyn gather).
    # NOTE: labels outside [0, C-1] other than IGNORE_INDEX yield tgt_logit=0
    # (PyTorch would raise); semantics otherwise match F.cross_entropy.
    cls = jax.lax.broadcasted_iota(jnp.int32, x.shape, 0)              # (C, TILE_P)
    tgt_logit = jnp.sum(jnp.where(cls == t, x, 0.0), axis=0, keepdims=True)

    valid = (t != IGNORE_INDEX) & in_bounds                            # (1, TILE_P)
    per_pixel = jnp.where(valid, lse - tgt_logit, 0.0)                 # (1, TILE_P)

    loss_total = jnp.sum(per_pixel)                                    # f32 scalar
    cnt_total = jnp.sum(valid.astype(jnp.int32))                       # i32 scalar

    # Place the scalars at element [0, 0] of the lane-dense output block.
    row = jax.lax.broadcasted_iota(jnp.int32, (_SUBLANE, _LANE), 0)
    col = jax.lax.broadcasted_iota(jnp.int32, (_SUBLANE, _LANE), 1)
    sel = (row == 0) & (col == 0)
    loss_ref[...] = jnp.where(sel, loss_total, 0.0).reshape(1, 1, _SUBLANE, _LANE)
    count_ref[...] = jnp.where(sel, cnt_total, jnp.int32(0)).reshape(
        1, 1, _SUBLANE, _LANE)


def _resize_bilinear_align_corners(x, ht, wt):
    """Plain-JAX glue: F.interpolate(mode='bilinear', align_corners=True)."""
    n, c, h, w = x.shape

    def coords(out, inn):
        if out == 1:
            return jnp.zeros((out,), jnp.float32)
        return jnp.arange(out, dtype=jnp.float32) * ((inn - 1) / (out - 1))

    yc, xc = coords(ht, h), coords(wt, w)
    y0 = jnp.floor(yc).astype(jnp.int32)
    x0 = jnp.floor(xc).astype(jnp.int32)
    y1 = jnp.minimum(y0 + 1, h - 1)
    x1 = jnp.minimum(x0 + 1, w - 1)
    wy = (yc - y0.astype(jnp.float32))[None, None, :, None]
    wx = (xc - x0.astype(jnp.float32))[None, None, None, :]

    def g(yy, xx):
        return x[:, :, yy, :][:, :, :, xx]

    top = g(y0, x0) * (1.0 - wx) + g(y0, x1) * wx
    bot = g(y1, x0) * (1.0 - wx) + g(y1, x1) * wx
    return top * (1.0 - wy) + bot * wy


def _pick_tile_p(hw, c, dtype_bytes):
    """Static tile choice: ~2 MiB of logits per step, lane-aligned, VMEM-safe
    on all of v5e/v6e/v7x (double-buffered footprint stays << 16 MiB)."""
    tp = _TILE_BYTES_TARGET // max(1, c * dtype_bytes)
    tp = max(_LANE, min(tp, _TILE_P_MAX))
    tp = (tp // _LANE) * _LANE
    if hw <= tp:
        return hw, 1                    # one block spanning the full pixel axis
    return tp, -(-hw // tp)             # ragged tail masked in-kernel


@jax.jit
def cross_entropy_loss_2d(logits, target):
    """logits: (N, C, H, W); target: (N, Ht, Wt) int. Returns scalar loss."""
    n, c, h, w = logits.shape
    nt, ht, wt = target.shape
    if (h, w) != (ht, wt):
        logits = _resize_bilinear_align_corners(logits, ht, wt)

    hw = ht * wt
    # Free reshapes only: no NHWC transpose, no pad, no f32 pre-cast.
    x = logits.reshape(n, c, hw)
    t = target.reshape(n, 1, hw).astype(jnp.int32)

    dtype_bytes = jnp.dtype(x.dtype).itemsize
    tile_p, num_p = _pick_tile_p(hw, c, dtype_bytes)

    loss_part, count_part = pl.pallas_call(
        functools.partial(_ce_kernel, hw=hw),
        out_shape=(
            jax.ShapeDtypeStruct((n, num_p, _SUBLANE, _LANE), jnp.float32),
            jax.ShapeDtypeStruct((n, num_p, _SUBLANE, _LANE), jnp.int32),
        ),
        grid_spec=pltpu.PrefetchScalarGridSpec(
            num_scalar_prefetch=0,
            grid=(n, num_p),
            in_specs=[
                pl.BlockSpec((1, c, tile_p), lambda i, j: (i, 0, j)),
                pl.BlockSpec((1, 1, tile_p), lambda i, j: (i, 0, j)),
            ],
            out_specs=[
                pl.BlockSpec((1, 1, _SUBLANE, _LANE), lambda i, j: (i, j, 0, 0)),
                pl.BlockSpec((1, 1, _SUBLANE, _LANE), lambda i, j: (i, j, 0, 0)),
            ],
        ),
        compiler_params=pltpu.CompilerParams(
            dimension_semantics=("parallel", "parallel"),
        ),
    )(x, t)

    # Tiny final reduction in plain JAX (tree reduce; exact int count).
    loss_sum = jnp.sum(loss_part)
    count = jnp.sum(count_part)
    return loss_sum / count.astype(jnp.float32)


def _reference_loss(logits, target):
    n, c, h, w = logits.shape
    x = jnp.transpose(logits, (0, 2, 3, 1)).reshape(-1, c).astype(jnp.float32)
    t = target.reshape(-1).astype(jnp.int32)
    valid = t != IGNORE_INDEX
    lse = jax.nn.logsumexp(x, axis=-1)
    tl = jnp.take_along_axis(x, jnp.clip(t, 0, c - 1)[:, None], axis=-1)[:, 0]
    per = jnp.where(valid, lse - tl, 0.0)
    return jnp.sum(per) / jnp.sum(valid.astype(jnp.float32))


if __name__ == "__main__":
    key = jax.random.PRNGKey(0)
    k1, k2, k3 = jax.random.split(key, 3)

    N, C, H, W = 2, 4, 16, 16
    logits = jax.random.normal(k1, (N, C, H, W), dtype=jnp.float32)
    target = jax.random.randint(k2, (N, H, W), 0, C, dtype=jnp.int32)
    # sprinkle some ignore_index pixels
    ignore_mask = jax.random.uniform(k3, (N, H, W)) < 0.1
    target = jnp.where(ignore_mask, IGNORE_INDEX, target)

    loss = cross_entropy_loss_2d(logits, target)
    jax.block_until_ready(loss)

    ref = _reference_loss(logits, target)
    assert jnp.allclose(loss, ref, rtol=1e-5, atol=1e-5), (loss, ref)

    print("KERNEL_OK")
</pallas_src>

<mosaic_0001>
module attributes {stable_mosaic.version = 11 : i64} {
  func.func @_ce_kernel(%arg0: i32, %arg1: i32, %arg2: memref<1x4x256xf32, #tpu.memory_space<vmem>>, %arg3: memref<1x1x256xi32, #tpu.memory_space<vmem>>, %arg4: memref<1x1x8x128xf32, #tpu.memory_space<vmem>>, %arg5: memref<1x1x8x128xi32, #tpu.memory_space<vmem>>) attributes {dimension_semantics = [#tpu.dimension_semantics<parallel>, #tpu.dimension_semantics<parallel>], iteration_bounds = array<i64: 2, 1>, scalar_prefetch = 0 : i64, scratch_operands = 0 : i64, tpu.core_type = #tpu.core_type<tc>, window_params = [{transform_indices = @transform_0, window_bounds = array<i64: 1, 4, 256>}, {transform_indices = @transform_1, window_bounds = array<i64: 1, 1, 256>}, {transform_indices = @transform_2, window_bounds = array<i64: 1, 1, 8, 128>}, {transform_indices = @transform_3, window_bounds = array<i64: 1, 1, 8, 128>}]} {
    %c0 = arith.constant 0 : index
    %c0_0 = arith.constant 0 : index
    %c0_1 = arith.constant 0 : index
    %0 = vector.load %arg2[%c0, %c0_0, %c0_1] : memref<1x4x256xf32, #tpu.memory_space<vmem>>, vector<1x4x256xf32>
    %1 = vector.shape_cast %0 : vector<1x4x256xf32> to vector<4x256xf32>
    %c0_2 = arith.constant 0 : index
    %c0_3 = arith.constant 0 : index
    %c0_4 = arith.constant 0 : index
    %2 = vector.load %arg3[%c0_2, %c0_3, %c0_4] : memref<1x1x256xi32, #tpu.memory_space<vmem>>, vector<1x1x256xi32>
    %3 = vector.shape_cast %2 : vector<1x1x256xi32> to vector<1x256xi32>
    %4 = tpu.iota {dimensions = array<i32: 1>} : vector<1x256xi32>
    %c256_i32 = arith.constant 256 : i32
    %5 = arith.muli %arg1, %c256_i32 : i32
    %6 = vector.broadcast %5 : i32 to vector<1x256xi32>
    %7 = arith.addi %4, %6 : vector<1x256xi32>
    %c256_i32_5 = arith.constant 256 : i32
    %8 = vector.broadcast %c256_i32_5 : i32 to vector<1x256xi32>
    %9 = arith.cmpi slt, %7, %8 : vector<1x256xi32>
    %cst = arith.constant dense<0xFF800000> : vector<256xf32>
    %10 = vector.multi_reduction <maximumf>, %1, %cst [0] : vector<4x256xf32> to vector<256xf32>
    %11 = vector.shape_cast %10 : vector<256xf32> to vector<1x256xf32>
    %12 = vector.broadcast %11 : vector<1x256xf32> to vector<4x256xf32>
    %13 = arith.subf %1, %12 : vector<4x256xf32>
    %14 = math.exp %13 : vector<4x256xf32>
    %cst_6 = arith.constant dense<0.000000e+00> : vector<256xf32>
    %15 = vector.multi_reduction <add>, %14, %cst_6 [0] : vector<4x256xf32> to vector<256xf32>
    %16 = vector.shape_cast %15 : vector<256xf32> to vector<1x256xf32>
    %17 = math.log %16 : vector<1x256xf32>
    %18 = arith.addf %17, %11 : vector<1x256xf32>
    %19 = tpu.iota {dimensions = array<i32: 0>} : vector<4x256xi32>
    %20 = vector.broadcast %3 : vector<1x256xi32> to vector<4x256xi32>
    %21 = arith.cmpi eq, %19, %20 : vector<4x256xi32>
    %cst_7 = arith.constant 0.000000e+00 : f32
    %22 = vector.broadcast %cst_7 : f32 to vector<4x256xf32>
    %23 = arith.select %21, %1, %22 : vector<4x256xi1>, vector<4x256xf32>
    %cst_8 = arith.constant dense<0.000000e+00> : vector<256xf32>
    %24 = vector.multi_reduction <add>, %23, %cst_8 [0] : vector<4x256xf32> to vector<256xf32>
    %25 = vector.shape_cast %24 : vector<256xf32> to vector<1x256xf32>
    %c250_i32 = arith.constant 250 : i32
    %26 = vector.broadcast %c250_i32 : i32 to vector<1x256xi32>
    %27 = arith.cmpi ne, %3, %26 : vector<1x256xi32>
    %28 = arith.andi %27, %9 : vector<1x256xi1>
    %29 = arith.subf %18, %25 : vector<1x256xf32>
    %cst_9 = arith.constant 0.000000e+00 : f32
    %30 = vector.broadcast %cst_9 : f32 to vector<1x256xf32>
    %31 = arith.select %28, %29, %30 : vector<1x256xi1>, vector<1x256xf32>
    %32 = vector.shape_cast %31 : vector<1x256xf32> to vector<1x1x256xf32>
    %cst_10 = arith.constant dense<0.000000e+00> : vector<1xf32>
    %33 = vector.multi_reduction <add>, %32, %cst_10 [1, 2] : vector<1x1x256xf32> to vector<1xf32>
    %34 = vector.shape_cast %33 : vector<1xf32> to vector<1x1x1xf32>
    %35 = vector.extract %34[0, 0, 0] : f32 from vector<1x1x1xf32>
    %36 = arith.extui %28 : vector<1x256xi1> to vector<1x256xi32>
    %37 = vector.shape_cast %36 : vector<1x256xi32> to vector<1x1x256xi32>
    %cst_11 = arith.constant dense<0> : vector<1xi32>
    %38 = vector.multi_reduction <add>, %37, %cst_11 [1, 2] : vector<1x1x256xi32> to vector<1xi32>
    %39 = vector.shape_cast %38 : vector<1xi32> to vector<1x1x1xi32>
    %40 = vector.extract %39[0, 0, 0] : i32 from vector<1x1x1xi32>
    %41 = tpu.iota {dimensions = array<i32: 0>} : vector<8x128xi32>
    %42 = tpu.iota {dimensions = array<i32: 1>} : vector<8x128xi32>
    %c0_i32 = arith.constant 0 : i32
    %43 = vector.broadcast %c0_i32 : i32 to vector<8x128xi32>
    %44 = arith.cmpi eq, %41, %43 : vector<8x128xi32>
    %c0_i32_12 = arith.constant 0 : i32
    %45 = vector.broadcast %c0_i32_12 : i32 to vector<8x128xi32>
    %46 = arith.cmpi eq, %42, %45 : vector<8x128xi32>
    %47 = arith.andi %44, %46 : vector<8x128xi1>
    %cst_13 = arith.constant 0.000000e+00 : f32
    %48 = vector.broadcast %35 : f32 to vector<8x128xf32>
    %49 = vector.broadcast %cst_13 : f32 to vector<8x128xf32>
    %50 = arith.select %47, %48, %49 : vector<8x128xi1>, vector<8x128xf32>
    %51 = vector.shape_cast %50 : vector<8x128xf32> to vector<1x1x8x128xf32>
    %c0_14 = arith.constant 0 : index
    %c0_15 = arith.constant 0 : index
    %c0_16 = arith.constant 0 : index
    %c0_17 = arith.constant 0 : index
    %52 = vector.load %arg4[%c0_14, %c0_15, %c0_16, %c0_17] : memref<1x1x8x128xf32, #tpu.memory_space<vmem>>, vector<1x1x8x128xf32>
    tpu.vector_store %arg4[%c0_14, %c0_15, %c0_16, %c0_17], %51 {strides = array<i32>} : memref<1x1x8x128xf32, #tpu.memory_space<vmem>>, vector<1x1x8x128xf32>,
    %c0_i32_18 = arith.constant 0 : i32
    %53 = vector.broadcast %40 : i32 to vector<8x128xi32>
    %54 = vector.broadcast %c0_i32_18 : i32 to vector<8x128xi32>
    %55 = arith.select %47, %53, %54 : vector<8x128xi1>, vector<8x128xi32>
    %56 = vector.shape_cast %55 : vector<8x128xi32> to vector<1x1x8x128xi32>
    %c0_19 = arith.constant 0 : index
    %c0_20 = arith.constant 0 : index
    %c0_21 = arith.constant 0 : index
    %c0_22 = arith.constant 0 : index
    %57 = vector.load %arg5[%c0_19, %c0_20, %c0_21, %c0_22] : memref<1x1x8x128xi32, #tpu.memory_space<vmem>>, vector<1x1x8x128xi32>
    tpu.vector_store %arg5[%c0_19, %c0_20, %c0_21, %c0_22], %56 {strides = array<i32>} : memref<1x1x8x128xi32, #tpu.memory_space<vmem>>, vector<1x1x8x128xi32>,
    return
  }
  func.func @transform_0(%arg0: i32, %arg1: i32) -> (i32, i32, i32) {
    %c0_i32 = arith.constant 0 : i32
    %c0_i32_0 = arith.constant 0 : i32
    return %arg0, %c0_i32, %arg1 : i32, i32, i32
  }
  func.func @transform_1(%arg0: i32, %arg1: i32) -> (i32, i32, i32) {
    %c0_i32 = arith.constant 0 : i32
    %c0_i32_0 = arith.constant 0 : i32
    return %arg0, %c0_i32, %arg1 : i32, i32, i32
  }
  func.func @transform_2(%arg0: i32, %arg1: i32) -> (i32, i32, i32, i32) {
    %c0_i32 = arith.constant 0 : i32
    %c0_i32_0 = arith.constant 0 : i32
    %c0_i32_1 = arith.constant 0 : i32
    return %arg0, %arg1, %c0_i32, %c0_i32_0 : i32, i32, i32, i32
  }
  func.func @transform_3(%arg0: i32, %arg1: i32) -> (i32, i32, i32, i32) {
    %c0_i32 = arith.constant 0 : i32
    %c0_i32_0 = arith.constant 0 : i32
    %c0_i32_1 = arith.constant 0 : i32
    return %arg0, %arg1, %c0_i32, %c0_i32_0 : i32, i32, i32, i32
  }
}

</mosaic_0001>

<bundles_post_ra>
// kernel: cross_entropy_loss_2d.1
= control target key start
LH: loop header
LB: loop body
LE: loop exit
PB: predicated region body
PF: predicated region fallthrough
CT: control target
= control target key end

     0   :  { %s680_s12 = smov 0   ;;  %s682_s13 = smov 0   ;;  %s768_s0 = inlined_call_operand.vmem [shape: f32[2,4,256], index: 0, kind: input, shape index: {}]   ;;  %s769_s1 = inlined_call_operand.vmem [shape: s32[2,1,256], index: 1, kind: input, shape index: {}]   ;;  %s770_s2 = inlined_call_operand.vmem [shape: f32[2,1,8,128], index: 2, kind: output, shape index: {0}]   ;;  %s771_s3 = inlined_call_operand.vmem [shape: s32[2,1,8,128], index: 3, kind: output, shape index: {1}]  }
   0x1   :  { %s684_s14 = smov 0  }
   0x2 LB: > { %s26_s15 = sadd.s32 1, %s651_s13  ;;  %p586_p0 = scmp.ge.s32.totalorder %s655_s14, 1  ;;  %s655_s14 = sphi %s684_s14, %s14_s14   ;;  %s651_s13 = sphi %s682_s13, %s775_s13   ;;  %s647_s12 = sphi %s680_s12, %s774_s12  }
   0x3   : > { %p28_p1 = scmp.ge.s32.totalorder %s26_s15, 2  ;;  %p179_p2 = scmp.lt.s32.totalorder %s655_s14, 3 }
   0x5   : > { %s777_s15 = smov (%p28_p1, %s26_s15), 0  ;;  %p180_p3 = pnand %p586_p0, %p179_p2 }
   0x6   : > { %p225_p4 = scmp.lt.s32.totalorder (!%p180_p3), %s647_s12, 1  ;;  %v259_v0 = vlaneseq (!%p180_p3)  ;;  %v657_v1 = vmov (!%p180_p3), 1966171168   ;;  %v658_v4 = vmov (!%p180_p3), 1   ;;  %vm271_vm0 = vcmask (!%p180_p3), 1043456  }
   0x7   : > { %183 = sbr.rel (%p180_p3) target bundleno = 302 (0x12e), region = 28  ;;  %v349_v2 = vunpack.c.l.s4 (!%p180_p3), %v657_v1  ;;  %v347_v5 = vcombine.low (!%p180_p3), %v658_v4, %v658_v4  ;;  %vm396_vm4 = vcmask (!%p180_p3), 1040384   ;;  %v659_v22 = vmov (!%p180_p3), 0  }
   0x8   : > { %v699_v3 = vshrl.u32 (!%p180_p3), %v259_v0, 7 }
   0x9   : > { %v350_v6 = vunpack.c.0.s8 (!%p180_p3), %v349_v2 }
   0xa   : > { %v718_v18 = vsub.s32 (!%p180_p3), 0, %v699_v3  ;;  %v721_v19 = vsub.s32 (!%p180_p3), 1, %v699_v3  ;;  %vm440_vm7 = vcmp.eq.s32.totalorder (!%p180_p3), %v699_v3, 0 }
   0xb   : > { %v707_v7 = vsub.s32 (!%p180_p3), %v350_v6, %v699_v3 }
   0xd   : > { %v354_v9 = vrot.slane (!%p180_p3), %v347_v5, %v707_v7 }
   0xe   : > { %s779_s12 = smov (!%p225_p4, %s647_s12), 1 }
   0xf   : > { %s589_s16 = sshll.u32 %s779_s12, 1  ;;  %s701_s17 = sshll.u32 %s779_s12, 3  ;;  %v361_v13 = vrot.slane %v354_v9, %v707_v7 }
  0x10   : > { %s241_s20 = scalar_lea.vmem %s769_s1, %s589_s16  ;;  %s232_s23 = scalar_lea.vmem %s768_s0, %s701_s17 }
  0x11   : > { %v257_v8 = vld [vmem:[%s232_s23] sm:$0xff]  ;;  %vm362_vm2 = vcmp.ne.s32.totalorder %v361_v13, 0  ;;  %s249_s26 = scalar_lea.vmem %s770_s2, %s701_s17  ;;  %s256_s30 = scalar_lea.vmem %s771_s3, %s701_s17 }
  0x12   : > { %v269_v10 = vcombine.high %v257_v8, %v257_v8  ;;  %v258_v11 = vld [vmem:[%s241_s20] sm:$0x3]  ;;  %v272_v12 = vsel %vm271_vm0, %v257_v8, -inf }
  0x13   : > { %vm344_vm1 = vcmp.ne.s32.totalorder %v258_v11, 250  ;;  %v273_v15 = vrot.slane %v272_v12, 4  ;;  %v321_v44 = vrot.slane %v258_v11, %v718_v18  ;;  %v325_v45 = vrot.slane %v258_v11, %v721_v19 }
  0x14   : > { %v279_v14 = vsel %vm271_vm0, %v269_v10, -inf  ;;  %vm723_vm3 = vmand %vm344_vm1, %vm362_vm2 }
  0x15   : > { %v280_v16 = vrot.slane %v279_v14, 4  ;;  %v274_v17 = vmax.f32 %v272_v12, %v273_v15  ;;  %v409_v23 = vsel %vm723_vm3, 1, %v659_v22  ;;  %vm326_vm5 = vcmp.eq.s32.totalorder %v699_v3, %v321_v44 }
  0x16   : > { %v413_v25 = vrot.slane %v409_v23, %v718_v18  ;;  %v417_v26 = vrot.slane %v409_v23, %v721_v19  ;;  %vm327_vm6 = vcmp.eq.s32.totalorder %v699_v3, %v325_v45  ;;  %v328_v46 = vsel %vm326_vm5, %v257_v8, 0.0 }
  0x17   : > { %v281_v21 = vmax.f32 %v279_v14, %v280_v16  ;;  %v275_v24 = vrot.slane %v274_v17, 2  ;;  %v329_v48 = vsel %vm327_vm6, %v269_v10, 0.0  ;;  %v330_v51 = vsel %vm271_vm0, %v328_v46, 0.0 }
  0x18   : > { %v418_v29 = vsel %vm396_vm4, %v413_v25, 0  ;;  %v419_v30 = vsel %vm396_vm4, %v417_v26, 0  ;;  %v337_v54 = vsel %vm271_vm0, %v329_v48, 0.0  ;;  %v331_v57 = vrot.slane %v330_v51, 4 }
  0x19   : > { %v282_v27 = vrot.slane %v281_v21, 2  ;;  %v276_v28 = vmax.f32 %v274_v17, %v275_v24  ;;  %v420_v32 = vadd.s32 %v419_v30, %v418_v29  ;;  %v338_v60 = vrot.slane %v337_v54, 4 }
  0x1a   : > { %v332_v63 = vadd.f32 %v331_v57, %v330_v51 }
  0x1b   : > { %v283_v31 = vmax.f32 %v281_v21, %v282_v27  ;;  %v277_v33 = vrot.slane %v276_v28, 1  ;;  %v422_v35 = vshrl.u32 %v420_v32, 16  ;;  %v421_v36 = vand.u32 65535, %v420_v32 }
  0x1c   : > { %v339_v4 = vadd.f32 %v338_v60, %v337_v54 }
  0x1d   : > { %v284_v34 = vrot.slane %v283_v31, 1  ;;  %v278_v37 = vmax.f32 %v276_v28, %v277_v33  ;;  %v424_v39 = vcvt.s32.f32 %v422_v35  ;;  %v423_v41 = vcvt.s32.f32 %v421_v36 }
  0x1e   : > { %v340_v10 = vrot.slane %v339_v4, 2 }
  0x1f   : > { %v285_v38 = vmax.f32 %v283_v31, %v284_v34  ;;  %427 = vadd.xlane.f32.xlu0 %v424_v39 }
  0x20   : > { %v341_v12 = vadd.f32 %v340_v10, %v339_v4 }
  0x21   : > { %v288_v40 = vcombine.low %v278_v37, %v285_v38 }
  0x22   : > { %v342_v14 = vrot.slane %v341_v12, 1 }
  0x23   : > { %v290_v42 = vsub.f32 %v257_v8, %v288_v40  ;;  %425 = vadd.xlane.f32.xlu0 %v423_v41  ;;  %v333_v8 = vrot.slane %v332_v63, 2 }
  0x24   : > { %v343_v24 = vadd.f32 %v342_v14, %v341_v12 }
  0x25   : > { %v291_v43 = vmul.f32 1.442695, %v290_v42  ;;  %v334_v11 = vadd.f32 %v333_v8, %v332_v63 }
  0x27   : > { %627 = vpow2.f32 %v291_v43  ;;  %v335_v13 = vrot.slane %v334_v11, 1 }
  0x29   : > { %v336_v17 = vadd.f32 %v335_v13, %v334_v11 }
  0x31   : > { %v628_v47 = vpop.eup %627 }
  0x32   : > { %v294_v49 = vcombine.high %v628_v47, %v628_v47  ;;  %v296_v50 = vsel %vm271_vm0, %v628_v47, 0.0 }
  0x33   : > { %v297_v52 = vrot.slane %v296_v50, 4 }
  0x34   : > { %v303_v53 = vsel %vm271_vm0, %v294_v49, 0.0 }
  0x35   : > { %v298_v55 = vadd.f32 %v297_v52, %v296_v50  ;;  %v304_v56 = vrot.slane %v303_v53, 4  ;;  %v260_v52 = vand.u32 127, %v259_v0 }
  0x37   : > { %v299_v58 = vrot.slane %v298_v55, 2  ;;  %v305_v59 = vadd.f32 %v304_v56, %v303_v53  ;;  %vm441_vm8 = vcmp.eq.s32.totalorder %v260_v52, 0 }
  0x38   : > { %vm442_vm9 = vmand %vm440_vm7, %vm441_vm8 }
  0x39   : > { %v300_v61 = vadd.f32 %v299_v58, %v298_v55  ;;  %v306_v62 = vrot.slane %v305_v59, 2 }
  0x3b   : > { %v301_v1 = vrot.slane %v300_v61, 1  ;;  %v307_v2 = vadd.f32 %v306_v62, %v305_v59 }
  0x3d   : > { %v302_v5 = vadd.f32 %v301_v1, %v300_v61  ;;  %v308_v6 = vrot.slane %v307_v2, 1 }
  0x3f   : > { %v309_v9 = vadd.f32 %v308_v6, %v307_v2  ;;  %629 = vlog2.f32 %v302_v5 }
  0x41   : > { %631 = vlog2.f32 %v309_v9 }
  0x49   : > { %v630_v15 = vpop.eup %629 }
  0x4a   : > { %v311_v16 = vmul.f32 0.6931472, %v630_v15 }
  0x4b   : > { %v632_v21 = vpop.eup %631 }
  0x4c   : > { %v313_v22 = vmul.f32 0.6931472, %v632_v21  ;;  %v314_v23 = vadd.f32 %v311_v16, %v278_v37 }
  0x4e   : > { %v315_v25 = vadd.f32 %v313_v22, %v285_v38  ;;  %v364_v26 = vsub.f32 %v314_v23, %v336_v17 }
  0x50   : > { %v365_v27 = vsub.f32 %v315_v25, %v343_v24 }
  0x52   : > { %v368_v28 = vcombine.low %v364_v26, %v365_v27 }
  0x54   : > { %v375_v29 = vrot.slane %v368_v28, %v707_v7 }
  0x56   : > { %v382_v30 = vrot.slane %v375_v29, %v707_v7 }
  0x58   : > { %v384_v31 = vsel %vm723_vm3, %v382_v30, 0.0 }
  0x59   : > { %v389_v32 = vrot.slane %v384_v31, %v718_v18  ;;  %v393_v33 = vrot.slane %v384_v31, %v721_v19 }
  0x5b   : > { %v397_v34 = vsel %vm396_vm4, %v389_v32, 0.0  ;;  %v398_v35 = vsel %vm396_vm4, %v393_v33, 0.0 }
  0x5c   : > { %v399_v36 = vadd.f32 %v398_v35, %v397_v34 }
  0x5e   : > { %400 = vadd.xlane.f32.xlu1 %v399_v36 }
  0xac   : > { %v428_v37 = vpop.xlane.xlu0 %427 }
  0xad   : > { %v430_v38 = vcvt.f32.s32 %v428_v37 }
  0xaf   : > { %v431_v40 = vshll.u32 %v430_v38, 16 }
  0xb0   : > { %v426_v39 = vpop.xlane.xlu0 %425 }
  0xb1   : > { %v429_v41 = vcvt.f32.s32 %v426_v39 }
  0xb3   : > { %v432_v42 = vadd.s32 %v431_v40, %v429_v41 }
  0xb5   : > { %v433_v7 = vrot.slane %v432_v42, 4 }
  0xb7   : > { %v434_v43 = vadd.s32 %v433_v7, %v432_v42 }
  0xb9   : > { %v435_v44 = vrot.slane %v434_v43, 2 }
  0xbb   : > { %v436_v19 = vadd.s32 %v435_v44, %v434_v43 }
  0xbd   : > { %v437_v48 = vrot.slane %v436_v19, 1 }
  0xbf   : > { %v438_v51 = vadd.s32 %v437_v48, %v436_v19 }
  0xeb   : > { %v401_v20 = vpop.xlane.xlu1 %400 }
  0xec   : > { %v402_v18 = vrot.slane %v401_v20, 4 }
  0xee   : > { %v403_v45 = vadd.f32 %v402_v18, %v401_v20 }
  0xf0   : > { %v404_v46 = vrot.slane %v403_v45, 2 }
  0xf2   : > { %v405_v47 = vadd.f32 %v404_v46, %v403_v45 }
  0xf4   : > { %v406_v49 = vrot.slane %v405_v47, 1 }
  0xf6   : > { %v407_v50 = vadd.f32 %v406_v49, %v405_v47 }
  0xf8   : > { %595 = vpush %v407_v50 }
  0xf9   : > { %597 = vpush %v438_v51 }
 0x129   : > { %s596_s27 = spop %595 }
 0x12a   : > { %v443_v53 = vstv %s596_s27  ;;  %s598_s4 = spop %597 }
 0x12b   : > { %v444_v54 = vsel %vm442_vm9, %v443_v53, 0.0  ;;  %v446_v55 = vstv %s598_s4 }
 0x12c   : > { %445 = vst [vmem:[%s249_s26] sm:$0xff] %v444_v54  ;;  %v447_v56 = vsel %vm442_vm9, %v446_v55, 0 }
 0x12d   : > { %448 = vst [vmem:[%s256_s30] sm:$0xff] %v447_v56 }
 0x12e PF: > { %s14_s14 = sadd.s32 1, %s655_s14   ;;  %s774_s12 = smov %s651_s13 }
 0x12f   : > { %p11_p5 = scmp.ge.s32.totalorder %s14_s14, 4   ;;  %s775_s13 = smov %s777_s15 }
 0x131   :  { %13 = sbr.rel (!%p11_p5) target bundleno = 2 (0x2), region = 73 }

</bundles_post_ra>
